<compile_context>
chip_gen: v7x
topology: tpu7x:2x2x1
jax: 0.10.0
libtpu: 0.0.40
codegen_flags: <defaults>
</compile_context>

<pallas_src>
import functools
import math

import jax
import jax.numpy as jnp
from jax.experimental import pallas as pl
from jax.experimental.pallas import tpu as pltpu


def _round_up(x, m):
    return ((x + m - 1) // m) * m


# ----------------------------------------------------------------------------
# Fused Pallas kernel: clamp -> int index -> 4x embedding gather -> concat
# ----------------------------------------------------------------------------
def _box2d_prompt_kernel(boxes_ref, bounds_ref, tables_ref, o_ref, *, steps):
    # boxes_ref : (TM, 4)      float32  raw box coords, one row per query
    # bounds_ref: (2, 4)       float32  row 0 = min_bounds, row 1 = max_bounds
    # tables_ref: (4, V, D4)   float32  stacked [x, y, w, h] embedding tables
    # o_ref     : (TM, 4*D4)   float32
    tm = boxes_ref.shape[0]
    v = tables_ref.shape[1]

    boxes = boxes_ref[...]                      # (TM, 4)
    mn = bounds_ref[0:1, :]                     # (1, 4)
    mx = bounds_ref[1:2, :]                     # (1, 4)

    # indexes = steps * clamp(boxes, min, max).int()
    # (.int() truncates toward zero; clamp guarantees >= 0, so trunc == floor)
    idx = jnp.clip(boxes, mn, mx).astype(jnp.int32) * steps          # (TM, 4)

    # Single lane iota reused for all four one-hot builds (VPU compares).
    lane = jax.lax.broadcasted_iota(jnp.int32, (tm, v), 1)            # (TM, V)

    parts = []
    for c in range(4):                                                # unrolled
        onehot = (lane == idx[:, c:c + 1]).astype(jnp.float32)        # (TM, V)
        # Exact gather: exactly one 1.0 per row; HIGHEST keeps full f32 mantissa.
        parts.append(
            jnp.dot(onehot, tables_ref[c],
                    preferred_element_type=jnp.float32,
                    precision=jax.lax.Precision.HIGHEST))             # (TM, D4)

    # Single lane-dense store of the concatenated embedding tile.
    o_ref[...] = jnp.concatenate(parts, axis=-1)


# ----------------------------------------------------------------------------
# Wrapper
# ----------------------------------------------------------------------------
def box2d_prompt_encoder_forward(boxes, tables, min_bounds, max_bounds,
                                 *, discretization_steps=1, block_m=256):
    """boxes: (..., 4); tables: (4, V, embed_dim//4) -> (..., embed_dim)."""
    *lead, four = boxes.shape
    assert four == 4
    M = math.prod(lead) if lead else 1
    num_tab, V, D4 = tables.shape
    assert num_tab == 4
    D = 4 * D4

    boxes2d = boxes.reshape(M, 4).astype(jnp.float32)

    # Row tile: multiple of 8 sublanes, capped so the (tm, V) one-hot temporaries
    # (plus the VMEM-resident tables) stay well inside the scoped-VMEM budget.
    onehot_budget = 4 << 20                           # ~4 MiB per live one-hot
    tm_cap = max(8, (onehot_budget // (4 * V)) // 8 * 8)
    tm = min(_round_up(max(M, 1), 8), block_m, tm_cap)
    Mp = _round_up(max(M, 1), tm)
    if Mp != M:
        # Padded rows clamp to index 0 (gather row 0) and are sliced off below.
        boxes2d = jnp.pad(boxes2d, ((0, Mp - M), (0, 0)))

    bounds = jnp.stack([min_bounds, max_bounds], axis=0).astype(jnp.float32)  # (2, 4)

    out = pl.pallas_call(
        functools.partial(_box2d_prompt_kernel, steps=int(discretization_steps)),
        out_shape=jax.ShapeDtypeStruct((Mp, D), jnp.float32),
        grid=(Mp // tm,),
        in_specs=[
            pl.BlockSpec((tm, 4), lambda i: (i, 0)),         # box rows (tiled)
            pl.BlockSpec((2, 4), lambda i: (0, 0)),          # [min; max] bounds
            pl.BlockSpec((4, V, D4), lambda i: (0, 0, 0)),   # stacked embedding tables
        ],
        out_specs=pl.BlockSpec((tm, D), lambda i: (i, 0)),
        compiler_params=pltpu.CompilerParams(
            dimension_semantics=("parallel",)),
    )(boxes2d, bounds, tables.astype(jnp.float32))

    return out[:M].reshape(*lead, D)


# ----------------------------------------------------------------------------
# Pure-JAX reference (for correctness check)
# ----------------------------------------------------------------------------
def reference_forward(boxes, tables, min_bounds, max_bounds, *, discretization_steps=1):
    idx = jnp.clip(boxes, min_bounds, max_bounds).astype(jnp.int32) * discretization_steps
    parts = [jnp.take(tables[c], idx[..., c], axis=0) for c in range(4)]
    return jnp.concatenate(parts, axis=-1)


# ----------------------------------------------------------------------------
if __name__ == "__main__":
    B, Nq = 2, 8
    embed_dim = 32
    max_x = max_y = max_w = max_h = 64      # small vocab for the demo
    discretization_steps = 1
    D4 = embed_dim // 4
    V = max_x * discretization_steps

    key = jax.random.PRNGKey(0)
    k_tab, k_box = jax.random.split(key)

    # nn.Embedding default init: N(0, 1); stacked [x, y, w, h] tables.
    tables = jax.random.normal(k_tab, (4, V, D4), jnp.float32)
    min_bounds = jnp.zeros((4,), jnp.float32)
    max_bounds = jnp.array([max_x - 1, max_y - 1, max_w - 1, max_h - 1], jnp.float32)

    # Box coords in pixels; include out-of-range values to exercise the clamp.
    boxes = jax.random.uniform(k_box, (B, Nq, 4), jnp.float32, -10.0, max_x + 10.0)

    out = box2d_prompt_encoder_forward(
        boxes, tables, min_bounds, max_bounds,
        discretization_steps=discretization_steps)
    out = jax.block_until_ready(out)

    ref = reference_forward(
        boxes, tables, min_bounds, max_bounds,
        discretization_steps=discretization_steps)
    ref = jax.block_until_ready(ref)

    assert out.shape == (B, Nq, embed_dim)
    assert jnp.allclose(out, ref, rtol=1e-5, atol=1e-5), "mismatch vs reference"
    print("KERNEL_OK")
</pallas_src>

<mosaic_0001>
module attributes {stable_mosaic.version = 11 : i64} {
  func.func @_box2d_prompt_kernel(%arg0: i32, %arg1: memref<16x4xf32, #tpu.memory_space<vmem>>, %arg2: memref<2x4xf32, #tpu.memory_space<vmem>>, %arg3: memref<4x64x8xf32, #tpu.memory_space<vmem>>, %arg4: memref<16x32xf32, #tpu.memory_space<vmem>>) attributes {dimension_semantics = [#tpu.dimension_semantics<parallel>], iteration_bounds = array<i64: 1>, scalar_prefetch = 0 : i64, scratch_operands = 0 : i64, tpu.core_type = #tpu.core_type<tc>, window_params = [{transform_indices = @transform_0, window_bounds = array<i64: 16, 4>}, {pipeline_mode = #tpu.pipeline_mode<synchronous>, transform_indices = @transform_1, window_bounds = array<i64: 2, 4>}, {pipeline_mode = #tpu.pipeline_mode<synchronous>, transform_indices = @transform_2, window_bounds = array<i64: 4, 64, 8>}, {transform_indices = @transform_3, window_bounds = array<i64: 16, 32>}]} {
    %c0 = arith.constant 0 : index
    %c0_0 = arith.constant 0 : index
    %0 = vector.load %arg1[%c0, %c0_0] : memref<16x4xf32, #tpu.memory_space<vmem>>, vector<16x4xf32>
    %c0_1 = arith.constant 0 : index
    %c0_2 = arith.constant 0 : index
    %1 = vector.load %arg2[%c0_1, %c0_2] : memref<2x4xf32, #tpu.memory_space<vmem>>, vector<1x4xf32>
    %c1 = arith.constant 1 : index
    %c0_3 = arith.constant 0 : index
    %2 = vector.load %arg2[%c1, %c0_3] : memref<2x4xf32, #tpu.memory_space<vmem>>, vector<1x4xf32>
    %3 = vector.broadcast %1 : vector<1x4xf32> to vector<16x4xf32>
    %4 = arith.maximumf %3, %0 : vector<16x4xf32>
    %5 = vector.broadcast %2 : vector<1x4xf32> to vector<16x4xf32>
    %6 = arith.minimumf %5, %4 : vector<16x4xf32>
    %7 = arith.fptosi %6 : vector<16x4xf32> to vector<16x4xi32>
    %c1_i32 = arith.constant 1 : i32
    %8 = vector.broadcast %c1_i32 : i32 to vector<16x4xi32>
    %9 = arith.muli %7, %8 : vector<16x4xi32>
    %10 = tpu.iota {dimensions = array<i32: 1>} : vector<16x64xi32>
    %11 = vector.extract_strided_slice %9 {offsets = [0, 0], sizes = [16, 1], strides = [1, 1]} : vector<16x4xi32> to vector<16x1xi32>
    %12 = vector.broadcast %11 : vector<16x1xi32> to vector<16x64xi32>
    %13 = arith.cmpi eq, %10, %12 : vector<16x64xi32>
    %14 = arith.extui %13 : vector<16x64xi1> to vector<16x64xi32>
    %15 = arith.sitofp %14 : vector<16x64xi32> to vector<16x64xf32>
    %c0_4 = arith.constant 0 : index
    %c0_5 = arith.constant 0 : index
    %c0_6 = arith.constant 0 : index
    %16 = vector.load %arg3[%c0_4, %c0_5, %c0_6] : memref<4x64x8xf32, #tpu.memory_space<vmem>>, vector<1x64x8xf32>
    %17 = vector.shape_cast %16 : vector<1x64x8xf32> to vector<64x8xf32>
    %cst = arith.constant dense<0.000000e+00> : vector<16x8xf32>
    %18 = tpu.matmul %15, %17, %cst {dimension_numbers = #tpu.dot_dimension_numbers<[1], [0], [0], [1], [0, 0, 1, 1], [], []>, precision = #tpu.contract_precision<fp32>} : vector<16x64xf32>, vector<64x8xf32>, vector<16x8xf32> -> vector<16x8xf32>
    %19 = vector.extract_strided_slice %9 {offsets = [0, 1], sizes = [16, 1], strides = [1, 1]} : vector<16x4xi32> to vector<16x1xi32>
    %20 = vector.broadcast %19 : vector<16x1xi32> to vector<16x64xi32>
    %21 = arith.cmpi eq, %10, %20 : vector<16x64xi32>
    %22 = arith.extui %21 : vector<16x64xi1> to vector<16x64xi32>
    %23 = arith.sitofp %22 : vector<16x64xi32> to vector<16x64xf32>
    %c1_7 = arith.constant 1 : index
    %c0_8 = arith.constant 0 : index
    %c0_9 = arith.constant 0 : index
    %24 = vector.load %arg3[%c1_7, %c0_8, %c0_9] : memref<4x64x8xf32, #tpu.memory_space<vmem>>, vector<1x64x8xf32>
    %25 = vector.shape_cast %24 : vector<1x64x8xf32> to vector<64x8xf32>
    %cst_10 = arith.constant dense<0.000000e+00> : vector<16x8xf32>
    %26 = tpu.matmul %23, %25, %cst_10 {dimension_numbers = #tpu.dot_dimension_numbers<[1], [0], [0], [1], [0, 0, 1, 1], [], []>, precision = #tpu.contract_precision<fp32>} : vector<16x64xf32>, vector<64x8xf32>, vector<16x8xf32> -> vector<16x8xf32>
    %27 = vector.extract_strided_slice %9 {offsets = [0, 2], sizes = [16, 1], strides = [1, 1]} : vector<16x4xi32> to vector<16x1xi32>
    %28 = vector.broadcast %27 : vector<16x1xi32> to vector<16x64xi32>
    %29 = arith.cmpi eq, %10, %28 : vector<16x64xi32>
    %30 = arith.extui %29 : vector<16x64xi1> to vector<16x64xi32>
    %31 = arith.sitofp %30 : vector<16x64xi32> to vector<16x64xf32>
    %c2 = arith.constant 2 : index
    %c0_11 = arith.constant 0 : index
    %c0_12 = arith.constant 0 : index
    %32 = vector.load %arg3[%c2, %c0_11, %c0_12] : memref<4x64x8xf32, #tpu.memory_space<vmem>>, vector<1x64x8xf32>
    %33 = vector.shape_cast %32 : vector<1x64x8xf32> to vector<64x8xf32>
    %cst_13 = arith.constant dense<0.000000e+00> : vector<16x8xf32>
    %34 = tpu.matmul %31, %33, %cst_13 {dimension_numbers = #tpu.dot_dimension_numbers<[1], [0], [0], [1], [0, 0, 1, 1], [], []>, precision = #tpu.contract_precision<fp32>} : vector<16x64xf32>, vector<64x8xf32>, vector<16x8xf32> -> vector<16x8xf32>
    %35 = vector.extract_strided_slice %9 {offsets = [0, 3], sizes = [16, 1], strides = [1, 1]} : vector<16x4xi32> to vector<16x1xi32>
    %36 = vector.broadcast %35 : vector<16x1xi32> to vector<16x64xi32>
    %37 = arith.cmpi eq, %10, %36 : vector<16x64xi32>
    %38 = arith.extui %37 : vector<16x64xi1> to vector<16x64xi32>
    %39 = arith.sitofp %38 : vector<16x64xi32> to vector<16x64xf32>
    %c3 = arith.constant 3 : index
    %c0_14 = arith.constant 0 : index
    %c0_15 = arith.constant 0 : index
    %40 = vector.load %arg3[%c3, %c0_14, %c0_15] : memref<4x64x8xf32, #tpu.memory_space<vmem>>, vector<1x64x8xf32>
    %41 = vector.shape_cast %40 : vector<1x64x8xf32> to vector<64x8xf32>
    %cst_16 = arith.constant dense<0.000000e+00> : vector<16x8xf32>
    %42 = tpu.matmul %39, %41, %cst_16 {dimension_numbers = #tpu.dot_dimension_numbers<[1], [0], [0], [1], [0, 0, 1, 1], [], []>, precision = #tpu.contract_precision<fp32>} : vector<16x64xf32>, vector<64x8xf32>, vector<16x8xf32> -> vector<16x8xf32>
    %43 = tpu.concatenate %18, %26, %34, %42 in 1 : vector<16x8xf32>, vector<16x8xf32>, vector<16x8xf32>, vector<16x8xf32> -> vector<16x32xf32>
    %c0_17 = arith.constant 0 : index
    %c0_18 = arith.constant 0 : index
    %44 = vector.load %arg4[%c0_17, %c0_18] : memref<16x32xf32, #tpu.memory_space<vmem>>, vector<16x32xf32>
    tpu.vector_store %arg4[%c0_17, %c0_18], %43 {strides = array<i32>} : memref<16x32xf32, #tpu.memory_space<vmem>>, vector<16x32xf32>,
    return
  }
  func.func @transform_0(%arg0: i32) -> (i32, i32) {
    %c0_i32 = arith.constant 0 : i32
    %c0_i32_0 = arith.constant 0 : i32
    return %arg0, %c0_i32 : i32, i32
  }
  func.func @transform_1(%arg0: i32) -> (i32, i32) {
    %c0_i32 = arith.constant 0 : i32
    %c0_i32_0 = arith.constant 0 : i32
    %c0_i32_1 = arith.constant 0 : i32
    return %c0_i32, %c0_i32_0 : i32, i32
  }
  func.func @transform_2(%arg0: i32) -> (i32, i32, i32) {
    %c0_i32 = arith.constant 0 : i32
    %c0_i32_0 = arith.constant 0 : i32
    %c0_i32_1 = arith.constant 0 : i32
    %c0_i32_2 = arith.constant 0 : i32
    return %c0_i32, %c0_i32_0, %c0_i32_1 : i32, i32, i32
  }
  func.func @transform_3(%arg0: i32) -> (i32, i32) {
    %c0_i32 = arith.constant 0 : i32
    %c0_i32_0 = arith.constant 0 : i32
    return %arg0, %c0_i32 : i32, i32
  }
}

</mosaic_0001>

<bundles_post_ra>
// kernel: tpu_custom_call.1
= control target key start
LH: loop header
LB: loop body
LE: loop exit
PB: predicated region body
PF: predicated region fallthrough
CT: control target
= control target key end

     0   :  { %v3737_v3 = vmov 1   ;;  %v3738_v4 = vmov 0   ;;  %s4623_s0 = inlined_call_operand.vmem [shape: f32[16,4], index: 0, kind: input, shape index: {}]   ;;  %s4624_s1 = inlined_call_operand.vmem [shape: f32[2,4], index: 1, kind: input, shape index: {}]   ;;  %s4625_s2 = inlined_call_operand.vmem [shape: f32[4,64,8], index: 2, kind: input, shape index: {}]   ;;  %s4626_s3 = inlined_call_operand.hbm [shape: f32[16,32], index: 3, kind: output, shape index: {}]  }
   0x1   :  { %v15_v0 = vld [vmem:[%s4623_s0] sm:$0xff]  ;;  %v16_v2 = vld [vmem:[%s4623_s0 + $0x8] sm:$0xff]  ;;  %3708 = vset.pattern.permute.xlu1 %v3737_v3  ;;  %3707 = vset.pattern.permute.xlu0 %v3738_v4 }
   0x2   :  { %v2515_v1 = vld [vmem:[%s4624_s1] ss:$0 sm:$0xff]  ;;  %v2516_v5 = vld [vmem:[%s4624_s1 + $0x1] ss:$0 sm:$0xff]  ;;  %v48_v9 = vld [vmem:[%s4625_s2 + $0x8] sm:$0xff] }
   0x3   :  { %v23_v6 = vmax.f32 %v2515_v1, %v15_v0  ;;  %v24_v7 = vmax.f32 %v2515_v1, %v16_v2  ;;  %v47_v8 = vld [vmem:[%s4625_s2] sm:$0xff]  ;;  %v66_v11 = vand.u32 4294901760, %v48_v9  ;;  %v2528_v13 = vld [vmem:[%s4625_s2 + $0x48] sm:$0xff] }
   0x4   :  { %v63_v10 = vand.u32 4294901760, %v47_v8  ;;  %v2527_v12 = vld [vmem:[%s4625_s2 + $0x40] sm:$0xff]  ;;  %v673_v17 = vand.u32 4294901760, %v2528_v13 }
   0x5   :  { %v29_v14 = vmin.f32 %v2516_v5, %v23_v6  ;;  %v30_v15 = vmin.f32 %v2516_v5, %v24_v7  ;;  %v670_v16 = vand.u32 4294901760, %v2527_v12 }
   0x6   :  { %8 = vsyncpa [#allocation3], 0  ;;  %v3791_v18 = vpack.c.bf16 %v66_v11, %v63_v10  ;;  %v3799_v22 = vld [vmem:[%s4625_s2 + $0x10] sm:$0xff]  ;;  %v3804_v23 = vld [vmem:[%s4625_s2 + $0x18] sm:$0xff]  ;;  %v3866_v43 = vsub.f32 %v47_v8, %v63_v10  ;;  %v3868_v44 = vsub.f32 %v48_v9, %v66_v11  ;;  %v3894_v50 = vsub.f32 %v2528_v13, %v673_v17  ;;  %s3743_s25 = smov 16   ;;  %s3744_s26 = smov 24  }
   0x7   :  { %v3693_v19 = vtrunc.f32 %v29_v14  ;;  %v3695_v20 = vtrunc.f32 %v30_v15  ;;  %v3793_v21 = vpack.c.bf16 %v673_v17, %v670_v16  ;;  %v3809_v24 = vld [vmem:[%s4625_s2 + $0x50] sm:$0xff]  ;;  %v69_v26 = vand.u32 4294901760, %v3799_v22  ;;  %v3820_v28 = vld [vmem:[%s4625_s2 + $0x58] sm:$0xff]  ;;  %v3836_v34 = vld [vmem:[%s4625_s2 + $0x20] sm:$0xff]  ;;  %s3745_s1 = smov [#allocation2]  }
   0x8   :  { %3270 = vmatprep.subr.bf16.mxu0 %v3791_v18  ;;  %v72_v27 = vand.u32 4294901760, %v3804_v23  ;;  %v676_v29 = vand.u32 4294901760, %v3809_v24  ;;  %v679_v30 = vand.u32 4294901760, %v3820_v28  ;;  %v3841_v35 = vld [vmem:[%s4625_s2 + $0x28] sm:$0xff]  ;;  %v3846_v36 = vld [vmem:[%s4625_s2 + $0x60] sm:$0xff]  ;;  %v75_v37 = vand.u32 4294901760, %v3836_v34 }
   0x9   :  { %v3811_v25 = vcvt.f32.s32 %v3693_v19  ;;  %3366 = vmatprep.subr.bf16.mxu1 %v3793_v21  ;;  %3272 = vmatpush3.bf16.msra.mxu0 %v3791_v18  ;;  %v3827_v31 = vcvt.f32.s32 %v3695_v20  ;;  %v78_v38 = vand.u32 4294901760, %v3841_v35  ;;  %v3854_v39 = vld [vmem:[%s4625_s2 + $0x68] sm:$0xff]  ;;  %v682_v40 = vand.u32 4294901760, %v3846_v36  ;;  %v3880_v46 = vld [vmem:[%s4625_s2 + $0x30] sm:$0xff]  ;;  %v3885_v47 = vld [vmem:[%s4625_s2 + $0x38] sm:$0xff]  ;;  %s2504_s27 = sshll.u32 %s3745_s1, 4  ;;  %s2505_s27 = int_to_ptr.vmem [resolvable:$true] %s2504_s27 }
   0xa   :  { %3368 = vmatpush3.bf16.msra.mxu1 %v3793_v21  ;;  %v3829_v32 = vpack.c.bf16 %v72_v27, %v69_v26  ;;  %v3831_v33 = vpack.c.bf16 %v679_v30, %v676_v29  ;;  %v685_v41 = vand.u32 4294901760, %v3854_v39  ;;  %v3890_v48 = vld [vmem:[%s4625_s2 + $0x70] sm:$0xff]  ;;  %v3892_v49 = vsub.f32 %v2527_v12, %v670_v16  ;;  %v3902_v53 = vld [vmem:[%s4625_s2 + $0x78] sm:$0xff]  ;;  %s3713_s28 = scalar_lea.vmem %s2505_s27, 256  ;;  %p3718_p1 = scmp.lt.s32.totalorder %s2505_s27, %s2505_s27 }
   0xb   :  { %643 = vperm.xlu1 %3708, %v3811_v25   ;;  %36 = vperm.xlu0 %3707, %v3811_v25   ;;  %v3864_v42 = vpack.c.bf16 %v78_v38, %v75_v37  ;;  %v81_v51 = vand.u32 4294901760, %v3880_v46  ;;  %v84_v52 = vand.u32 4294901760, %v3885_v47  ;;  %v688_v54 = vand.u32 4294901760, %v3890_v48  ;;  %p3714_p0 = scmp.ne.s32.totalorder %s2505_s27, %s3713_s28  ;;  %p3719_p2 = scmp.lt.s32.totalorder %s3713_s28, %s3713_s28 }
   0xc   :  { %3274 = vmatprep.subr.bf16.mxu0 %v3829_v32  ;;  %3370 = vmatprep.subr.bf16.mxu1 %v3831_v33  ;;  %v3875_v45 = vpack.c.bf16 %v685_v41, %v682_v40  ;;  %v158_v55 = vand.u32 4294901760, %v3866_v43  ;;  %v691_v56 = vand.u32 4294901760, %v3902_v53  ;;  %v165_v57 = vand.u32 4294901760, %v3868_v44 }
   0xd   :  { %3276 = vmatpush3.bf16.msra.mxu0 %v3829_v32  ;;  %v765_v58 = vand.u32 4294901760, %v3892_v49  ;;  %v772_v59 = vand.u32 4294901760, %v3894_v50  ;;  %v3739_v60 = vmov 2   ;;  %v3916_v61 = vpack.c.bf16 %v84_v52, %v81_v51  ;;  %p3720_p3 = por %p3719_p2, %p3718_p1 }
   0xe   :  { %3372 = vmatpush3.bf16.msra.mxu1 %v3831_v33  ;;  %3278 = vmatprep.subr.bf16.mxu0 %v3864_v42  ;;  %v159_v62 = vsub.f32 %v3866_v43, %v158_v55  ;;  %v3927_v63 = vpack.c.bf16 %v691_v56, %v688_v54  ;;  %v166_v0 = vsub.f32 %v3868_v44, %v165_v57  ;;  %v3740_v13 = vmov 3  }
   0xf   :  { %646 = vperm.xlu1 %3708, %v3827_v31   ;;  %39 = vperm.xlu0 %3707, %v3827_v31   ;;  %v766_v1 = vsub.f32 %v3892_v49, %v765_v58  ;;  %v773_v3 = vsub.f32 %v3894_v50, %v772_v59  ;;  %v3941_v4 = vsub.f32 %v3799_v22, %v69_v26  ;;  %vm55_vm0 = vcmask 523264   ;;  %p3721_p4 = pnand %p3720_p3, %p3714_p0 }
  0x10   :  { %3374 = vmatprep.subr.bf16.mxu1 %v3875_v45  ;;  %v160_v2 = vand.u32 4294901760, %v159_v62  ;;  %v3944_v5 = vsub.f32 %v3804_v23, %v72_v27  ;;  %v167_v6 = vand.u32 4294901760, %v166_v0  ;;  %v3949_v8 = vsub.f32 %v3809_v24, %v676_v29 }
  0x11   :  { %3280 = vmatpush3.bf16.msra.mxu0 %v3864_v42  ;;  %v767_v7 = vand.u32 4294901760, %v766_v1  ;;  %v3952_v9 = vsub.f32 %v3820_v28, %v679_v30  ;;  %v774_v10 = vand.u32 4294901760, %v773_v3  ;;  %v172_v11 = vand.u32 4294901760, %v3941_v4 }
  0x12   :  { %3376 = vmatpush3.bf16.msra.mxu1 %v3875_v45  ;;  %3282 = vmatprep.subr.bf16.mxu0 %v3916_v61  ;;  %v179_v12 = vand.u32 4294901760, %v3944_v5  ;;  %v3956_v14 = vpack.c.bf16 %v167_v6, %v160_v2  ;;  %v779_v15 = vand.u32 4294901760, %v3949_v8  ;;  %v3961_v17 = vsub.f32 %v3836_v34, %v75_v37 }
  0x13   :  { %3710 = vset.pattern.permute.xlu1 %v3739_v60  ;;  %3709 = vset.pattern.permute.xlu0 %v3739_v60  ;;  %v786_v16 = vand.u32 4294901760, %v3952_v9  ;;  %v3965_v19 = vpack.c.bf16 %v774_v10, %v767_v7  ;;  %v173_v20 = vsub.f32 %v3941_v4, %v172_v11  ;;  %v192_v26 = vsub.f32 %v3841_v35, %v78_v38 }
  0x14   :  { %1253 = vperm.xlu1 %3710, %v3827_v31   ;;  %1250 = vperm.xlu0 %3709, %v3811_v25   ;;  %v180_v22 = vsub.f32 %v3944_v5, %v179_v12  ;;  %v780_v23 = vsub.f32 %v3949_v8, %v779_v15  ;;  %v792_v29 = vsub.f32 %v3846_v36, %v682_v40  ;;  %vm2487_vm9 = vcmask 64512  }
  0x15   :  { %3378 = vmatprep.subr.bf16.mxu1 %v3927_v63  ;;  %3284 = vmatpush3.bf16.msra.mxu0 %v3916_v61  ;;  %v787_v24 = vsub.f32 %v3952_v9, %v786_v16  ;;  %v174_v27 = vand.u32 4294901760, %v173_v20  ;;  %v799_v30 = vsub.f32 %v3854_v39, %v685_v41  ;;  %v193_v60 = vand.u32 4294901760, %v192_v26 }
  0x16   :  { %3380 = vmatpush3.bf16.msra.mxu1 %v3927_v63  ;;  %3286 = vmatprep.subr.bf16.mxu0 %v3956_v14  ;;  %v181_v28 = vand.u32 4294901760, %v180_v22  ;;  %v793_v35 = vand.u32 4294901760, %v792_v29  ;;  %v199_v0 = vsub.f32 %v3880_v46, %v81_v51  ;;  %v206_v39 = vsub.f32 %v3885_v47, %v84_v52 }
  0x17   :  { %3382 = vmatprep.subr.bf16.mxu1 %v3965_v19  ;;  %v788_v34 = vand.u32 4294901760, %v787_v24  ;;  %v800_v38 = vand.u32 4294901760, %v799_v30  ;;  %v194_v40 = vsub.f32 %v192_v26, %v193_v60  ;;  %v806_v6 = vsub.f32 %v3890_v48, %v688_v54 }
  0x18   :  { %3711 = vset.pattern.permute.xlu1 %v3740_v13  ;;  %3712 = vset.pattern.permute.xlu0 %v3740_v13  ;;  %v3993_v62 = vpack.c.bf16 %v181_v28, %v174_v27  ;;  %v794_v41 = vsub.f32 %v792_v29, %v793_v35  ;;  %v200_v3 = vand.u32 4294901760, %v199_v0  ;;  %v207_v10 = vand.u32 4294901760, %v206_v39 }
  0x19   :  { %1857 = vperm.xlu1 %3711, %v3811_v25   ;;  %1860 = vperm.xlu0 %3712, %v3827_v31   ;;  %v186_v25 = vand.u32 4294901760, %v3961_v17  ;;  %v781_v31 = vand.u32 4294901760, %v780_v23  ;;  %v801_v2 = vsub.f32 %v799_v30, %v800_v38  ;;  %v195_v7 = vand.u32 4294901760, %v194_v40 }
  0x1a   :  { %v813_v46 = vsub.f32 %v3902_v53, %v691_v56  ;;  %v795_v51 = vand.u32 4294901760, %v794_v41  ;;  %v201_v20 = vsub.f32 %v199_v0, %v200_v3  ;;  %v807_v22 = vand.u32 4294901760, %v806_v6 }
  0x1b   :  { %v187_v37 = vsub.f32 %v3961_v17, %v186_v25  ;;  %v3998_v1 = vpack.c.bf16 %v788_v34, %v781_v31  ;;  %v802_v13 = vand.u32 4294901760, %v801_v2  ;;  %v208_v47 = vsub.f32 %v206_v39, %v207_v10 }
  0x1c   :  { %v814_v52 = vand.u32 4294901760, %v813_v46  ;;  %v202_v27 = vand.u32 4294901760, %v201_v20  ;;  %v808_v28 = vsub.f32 %v806_v6, %v807_v22  ;;  %v4019_v53 = vpack.c.bf16 %v3868_v44, %v3866_v43 }
  0x1d   :  { %v188_v36 = vand.u32 4294901760, %v187_v37  ;;  %v4011_v24 = vpack.c.bf16 %v802_v13, %v795_v51  ;;  %v209_v31 = vand.u32 4294901760, %v208_v47  ;;  %v4023_v56 = vpack.c.bf16 %v3894_v50, %v3892_v49 }
  0x1e   :  { %v815_v48 = vsub.f32 %v813_v46, %v814_v52  ;;  %v809_v54 = vand.u32 4294901760, %v808_v28  ;;  %v4031_v41 = vpack.c.bf16 %v3952_v9, %v3949_v8  ;;  %v4034_v2 = vpack.c.bf16 %v192_v26, %v3961_v17 }
  0x1f   :  { %v4009_v23 = vpack.c.bf16 %v195_v7, %v188_v36  ;;  %v4013_v34 = vpack.c.bf16 %v209_v31, %v202_v27  ;;  %v4027_v36 = vpack.c.bf16 %v3944_v5, %v3941_v4  ;;  %v4036_v7 = vpack.c.bf16 %v799_v30, %v792_v29 }
  0x20   :  { %v816_v37 = vand.u32 4294901760, %v815_v48  ;;  %v4038_v51 = vpack.c.bf16 %v206_v39, %v199_v0  ;;  %v4040_v13 = vpack.c.bf16 %v813_v46, %v806_v6  ;;  %v4046_v20 = vpack.c.bf16 %v165_v57, %v158_v55 }
  0x21   :  { %v4052_v47 = vpack.c.bf16 %v772_v59, %v765_v58  ;;  %v4058_v17 = vpack.c.bf16 %v179_v12, %v172_v11  ;;  %v4064_v43 = vpack.c.bf16 %v786_v16, %v779_v15  ;;  %v4066_v44 = vpack.c.bf16 %v193_v60, %v186_v25 }
  0x22   :  { %v4015_v40 = vpack.c.bf16 %v816_v37, %v809_v54  ;;  %v4068_v55 = vpack.c.bf16 %v800_v38, %v793_v35  ;;  %v4070_v49 = vpack.c.bf16 %v207_v10, %v200_v3  ;;  %v4072_v50 = vpack.c.bf16 %v814_v52, %v807_v22 }
  0x23   :  { %v33_v57 = vlaneseq  ;;  %v3741_v5 = vmov 0.0   ;;  %vm2490_vm10 = vcmask 130048   ;;  %vm2493_vm11 = vcmask 195584  }
  0x24   :  { %vm2496_vm12 = vcmask 261120  }
  0x25   :  { %v34_v58 = vand.u32 127, %v33_v57 }
  0x8a   :  { %v644_v59 = vpop.permute.xlu1 %643  ;;  %v37_v4 = vpop.permute.xlu0 %36 }
  0x8b   :  { %vm648_vm1 = vcmp.eq.s32.totalorder %v34_v58, %v644_v59  ;;  %vm41_vm2 = vcmp.eq.s32.totalorder %v34_v58, %v37_v4 }
  0x8c   :  { %v4074_v8 = vsel %vm648_vm1, 1.0, %v3741_v5  ;;  %v4076_v9 = vsel %vm41_vm2, 1.0, %v3741_v5 }
  0x8d   :  { %v57_v11 = vsel %vm55_vm0, %v4076_v9, 0  ;;  %v664_v12 = vsel %vm55_vm0, %v4074_v8, 0 }
  0x8e   :  { %v647_v15 = vpop.permute.xlu1 %646  ;;  %v40_v16 = vpop.permute.xlu0 %39  ;;  %v4082_v25 = vsub.f32 %v57_v11, %v57_v11  ;;  %v4084_v26 = vsub.f32 %v664_v12, %v664_v12 }
  0x8f   :  { %vm649_vm3 = vcmp.eq.s32.totalorder %v34_v58, %v647_v15  ;;  %vm42_vm4 = vcmp.eq.s32.totalorder %v34_v58, %v40_v16 }
  0x90   :  { %v4086_v29 = vsel %vm649_vm3, 1.0, %v3741_v5  ;;  %v4088_v30 = vsel %vm42_vm4, 1.0, %v3741_v5  ;;  %v137_v60 = vand.u32 4294901760, %v4082_v25  ;;  %v744_v35 = vand.u32 4294901760, %v4084_v26 }
  0x91   :  { %v667_v38 = vsel %vm55_vm0, %v4086_v29, 0  ;;  %v60_v0 = vsel %vm55_vm0, %v4088_v30, 0 }
  0x92   :  { %v4096_v39 = vsub.f32 %v667_v38, %v667_v38  ;;  %v4098_v3 = vsub.f32 %v60_v0, %v60_v0  ;;  %v138_v6 = vsub.f32 %v4082_v25, %v137_v60  ;;  %v745_v10 = vsub.f32 %v4084_v26, %v744_v35 }
  0x93   :  { %v1254_v46 = vpop.permute.xlu1 %1253  ;;  %v1251_v22 = vpop.permute.xlu0 %1250 }
  0x94   :  { %v139_v52 = vand.u32 4294901760, %v138_v6  ;;  %v746_v27 = vand.u32 4294901760, %v745_v10  ;;  %v147_v28 = vand.u32 4294901760, %v4098_v3  ;;  %v754_v31 = vand.u32 4294901760, %v4096_v39 }
  0x95   :  { %vm1256_vm5 = vcmp.eq.s32.totalorder %v34_v58, %v1254_v46  ;;  %vm1255_vm6 = vcmp.eq.s32.totalorder %v34_v58, %v1251_v22 }
  0x96   :  { %2829 = vmatprep.mubr.f32.mxu0 %v139_v52  ;;  %2943 = vmatprep.mubr.f32.mxu1 %v746_v27  ;;  %v148_v48 = vsub.f32 %v4098_v3, %v147_v28  ;;  %v755_v54 = vsub.f32 %v4096_v39, %v754_v31  ;;  %v4114_v37 = vsel %vm1256_vm5, 1.0, %v3741_v5  ;;  %v4116_v57 = vsel %vm1255_vm6, 1.0, %v3741_v5 }
  0x98   :  { %v149_v59 = vand.u32 4294901760, %v148_v48  ;;  %v756_v4 = vand.u32 4294901760, %v755_v54  ;;  %v1858_v11 = vpop.permute.xlu1 %1857  ;;  %v1861_v12 = vpop.permute.xlu0 %1860 }
  0x99   :  { %vm1862_vm7 = vcmp.eq.s32.totalorder %v34_v58, %v1858_v11  ;;  %vm1863_vm8 = vcmp.eq.s32.totalorder %v34_v58, %v1861_v12 }
  0x9a   :  { %2830 = vmatmul.mubr.f32.vlgmr.msra.gmra.mrb[0].mxu0 %v149_v59  ;;  %2944 = vmatmul.mubr.f32.vlgmr.msra.gmra.mrb[0].mxu1 %v756_v4  ;;  %v4118_v15 = vsel %vm1862_vm7, 1.0, %v3741_v5  ;;  %v4120_v16 = vsel %vm1863_vm8, 1.0, %v3741_v5 }
  0x9b   :  { %3288 = vmatpush3.bf16.msra.mxu0 %v3956_v14  ;;  %3384 = vmatpush3.bf16.msra.mxu1 %v3965_v19  ;;  %v1271_v14 = vsel %vm55_vm0, %v4116_v57, 0  ;;  %v2543_v19 = vld [vmem:[%s4625_s2 + $0x80] sm:$0xff]  ;;  %v1881_v12 = vsel %vm55_vm0, %v4120_v16, 0 }
  0x9c   :  { %2848 = vmatprep.mubr.msk.f32.mxu0 %vm55_vm0, %v4076_v9  ;;  %2962 = vmatprep.mubr.msk.f32.mxu1 %vm55_vm0, %v4074_v8 }
  0x9d   :  { %3290 = vmatprep.subr.bf16.mxu0 %v3993_v62  ;;  %3386 = vmatprep.subr.bf16.mxu1 %v3998_v1 }
  0x9f   :  { %3292 = vmatpush3.bf16.msra.mxu0 %v3993_v62  ;;  %3388 = vmatpush3.bf16.msra.mxu1 %v3998_v1  ;;  %v1878_v62 = vsel %vm55_vm0, %v4118_v15, 0  ;;  %v2544_v1 = vld [vmem:[%s4625_s2 + $0x88] sm:$0xff] }
  0xa0   :  { %3294 = vmatprep.subr.bf16.mxu0 %v4009_v23  ;;  %3390 = vmatprep.subr.bf16.mxu1 %v4011_v24 }
  0xa3   :  { %3296 = vmatpush3.bf16.msra.mxu0 %v4009_v23  ;;  %3392 = vmatpush3.bf16.msra.mxu1 %v4011_v24  ;;  %v2560_v23 = vld [vmem:[%s4625_s2 + $0xc8] sm:$0xff]  ;;  %v4237_v24 = vsub.f32 %v1271_v14, %v1271_v14 }
  0xa4   :  { %3298 = vmatprep.subr.bf16.mxu0 %v4013_v34  ;;  %3394 = vmatprep.subr.bf16.mxu1 %v4015_v40 }
  0xa7   :  { %3300 = vmatpush3.bf16.msra.mxu0 %v4013_v34  ;;  %3396 = vmatpush3.bf16.msra.mxu1 %v4015_v40  ;;  %v2546_v34 = vld [vmem:[%s4625_s2 + $0x98] sm:$0xff]  ;;  %v4248_v40 = vld [vmem:[%s4625_s2 + $0xd0] sm:$0xff] }
  0xa8   :  { %3302 = vmatprep.subr.bf16.mxu0 %v4019_v53  ;;  %3398 = vmatprep.subr.bf16.mxu1 %v4023_v56 }
  0xaa   :  { %2849 = vmatmul.mubr.msk.f32.vlgmr.msra.gmra.mrb[0].mxu0 %vm55_vm0, %v4088_v30  ;;  %2963 = vmatmul.mubr.msk.f32.vlgmr.msra.gmra.mrb[0].mxu1 %vm55_vm0, %v4086_v29 }
  0xab   :  { %3304 = vmatpush3.bf16.msra.mxu0 %v4019_v53  ;;  %2867 = vmatprep.mubr.f32.mxu0 %v4082_v25  ;;  %v1277_v53 = vand.u32 4294901760, %v2543_v19 }
  0xac   :  { %3400 = vmatpush3.bf16.msra.mxu1 %v4023_v56  ;;  %2981 = vmatprep.mubr.f32.mxu1 %v4084_v26  ;;  %v4251_v56 = vsub.f32 %v1878_v62, %v1878_v62 }
  0xad   :  { %3306 = vmatprep.subr.bf16.mxu0 %v4027_v36  ;;  %3402 = vmatprep.subr.bf16.mxu1 %v4031_v41 }
  0xae   :  { %v1958_v25 = vand.u32 4294901760, %v4251_v56 }
  0xaf   :  { %3308 = vmatpush3.bf16.msra.mxu0 %v4027_v36  ;;  %v4256_v36 = vld [vmem:[%s4625_s2 + $0xd8] sm:$0xff] }
  0xb0   :  { %3404 = vmatpush3.bf16.msra.mxu1 %v4031_v41  ;;  %3310 = vmatprep.subr.bf16.mxu0 %v4034_v2  ;;  %v1280_v41 = vand.u32 4294901760, %v2544_v1 }
  0xb1   :  { %3406 = vmatprep.subr.bf16.mxu1 %v4036_v7 }
  0xb2   :  { %v4297_v58 = vsub.f32 %v2544_v1, %v1280_v41 }
  0xb3   :  { %3312 = vmatpush3.bf16.msra.mxu0 %v4034_v2 }
  0xb4   :  { %3408 = vmatpush3.bf16.msra.mxu1 %v4036_v7  ;;  %3314 = vmatprep.subr.bf16.mxu0 %v4038_v51  ;;  %v1887_v7 = vand.u32 4294901760, %v2560_v23  ;;  %v1379_v22 = vand.u32 4294901760, %v4297_v58 }
  0xb5   :  { %3410 = vmatprep.subr.bf16.mxu1 %v4040_v13 }
  0xb6   :  { %v4304_v26 = vsub.f32 %v2560_v23, %v1887_v7  ;;  %v1380_v1 = vsub.f32 %v4297_v58, %v1379_v22 }
  0xb7   :  { %3316 = vmatpush3.bf16.msra.mxu0 %v4038_v51  ;;  %v4262_v51 = vld [vmem:[%s4625_s2 + $0xa0] sm:$0xff] }
  0xb8   :  { %3412 = vmatpush3.bf16.msra.mxu1 %v4040_v13  ;;  %3318 = vmatprep.subr.bf16.mxu0 %v3791_v18  ;;  %v4267_v13 = vld [vmem:[%s4625_s2 + $0xa8] sm:$0xff]  ;;  %v1986_v48 = vand.u32 4294901760, %v4304_v26 }
  0xb9   :  { %3414 = vmatprep.subr.bf16.mxu1 %v3793_v21 }
  0xba   :  { %2868 = vmatmul.mubr.f32.vlgmr.msra.gmra.mrb[0].mxu0 %v4098_v3 }
  0xbb   :  { %2982 = vmatmul.mubr.f32.vlgmr.msra.gmra.mrb[0].mxu1 %v4096_v39  ;;  %3320 = vmatpush3.bf16.msra.mxu0 %v3791_v18 }
  0xbc   :  { %2886 = vmatprep.mubr.f32.mxu0 %v137_v60  ;;  %3416 = vmatpush3.bf16.msra.mxu1 %v3793_v21  ;;  %v4307_v60 = vpack.c.bf16 %v1280_v41, %v1277_v53  ;;  %v4389_v41 = vsub.f32 %v1881_v12, %v1881_v12 }
  0xbd   :  { %3000 = vmatprep.mubr.f32.mxu1 %v744_v35  ;;  %3322 = vmatprep.subr.bf16.mxu0 %v3829_v32 }
  0xbe   :  { %3418 = vmatprep.subr.bf16.mxu1 %v3831_v33 }
  0xbf   :  { %3324 = vmatpush3.bf16.msra.mxu0 %v3829_v32 }
  0xc0   :  { %3420 = vmatpush3.bf16.msra.mxu1 %v3831_v33  ;;  %3326 = vmatprep.subr.bf16.mxu0 %v3864_v42 }
  0xc1   :  { %3422 = vmatprep.subr.bf16.mxu1 %v3875_v45 }
  0xc3   :  { %3328 = vmatpush3.bf16.msra.mxu0 %v3864_v42 }
  0xc4   :  { %3424 = vmatpush3.bf16.msra.mxu1 %v3875_v45  ;;  %3330 = vmatprep.subr.bf16.mxu0 %v3916_v61 }
  0xc5   :  { %3426 = vmatprep.subr.bf16.mxu1 %v3927_v63 }
  0xc7   :  { %3332 = vmatpush3.bf16.msra.mxu0 %v3916_v61 }
  0xc8   :  { %3428 = vmatpush3.bf16.msra.mxu1 %v3927_v63  ;;  %3334 = vmatprep.subr.bf16.mxu0 %v4046_v20 }
  0xc9   :  { %3430 = vmatprep.subr.bf16.mxu1 %v4052_v47 }
  0xca   :  { %2887 = vmatmul.mubr.f32.vlgmr.msra.gmra.mrb[0].mxu0 %v147_v28 }
  0xcb   :  { %3001 = vmatmul.mubr.f32.vlgmr.msra.gmra.mrb[0].mxu1 %v754_v31  ;;  %3336 = vmatpush3.bf16.msra.mxu0 %v4046_v20  ;;  %v1959_v31 = vsub.f32 %v4251_v56, %v1958_v25 }
  0xcc   :  { %2905 = vmatprep.mubr.msk.f32.mxu0 %vm55_vm0, %v4076_v9  ;;  %3432 = vmatpush3.bf16.msra.mxu1 %v4052_v47  ;;  %v1286_v47 = vand.u32 4294901760, %v2546_v34 }
  0xcd   :  { %3019 = vmatprep.mubr.msk.f32.mxu1 %vm55_vm0, %v4074_v8  ;;  %3338 = vmatprep.subr.bf16.mxu0 %v4058_v17  ;;  %v1960_v23 = vand.u32 4294901760, %v1959_v31 }
  0xce   :  { %3434 = vmatprep.subr.bf16.mxu1 %v4064_v43  ;;  %v4350_v11 = vsub.f32 %v2546_v34, %v1286_v47 }
  0xcf   :  { %3340 = vmatpush3.bf16.msra.mxu0 %v4058_v17  ;;  %v4275_v17 = vld [vmem:[%s4625_s2 + $0xe0] sm:$0xff] }
  0xd0   :  { %3436 = vmatpush3.bf16.msra.mxu1 %v4064_v43  ;;  %3342 = vmatprep.subr.bf16.mxu0 %v4066_v44  ;;  %v4280_v43 = vld [vmem:[%s4625_s2 + $0xe8] sm:$0xff]  ;;  %v1896_v35 = vand.u32 4294901760, %v4275_v17 }
  0xd1   :  { %3438 = vmatprep.subr.bf16.mxu1 %v4068_v55  ;;  %v1899_v38 = vand.u32 4294901760, %v4280_v43 }
  0xd3   :  { %3344 = vmatpush3.bf16.msra.mxu0 %v4066_v44  ;;  %v4282_v44 = vsub.f32 %v2543_v19, %v1277_v53  ;;  %v4345_v54 = vpack.c.bf16 %v1899_v38, %v1896_v35 }
  0xd4   :  { %3440 = vmatpush3.bf16.msra.mxu1 %v4068_v55  ;;  %3346 = vmatprep.subr.bf16.mxu0 %v4070_v49  ;;  %v4289_v55 = vld [vmem:[%s4625_s2 + $0xb0] sm:$0xff] }
  0xd5   :  { %3442 = vmatprep.subr.bf16.mxu1 %v4072_v50  ;;  %v1295_v39 = vand.u32 4294901760, %v4289_v55  ;;  %v1372_v6 = vand.u32 4294901760, %v4282_v44 }
  0xd7   :  { %3348 = vmatpush3.bf16.msra.mxu0 %v4070_v49  ;;  %v4294_v49 = vld [vmem:[%s4625_s2 + $0xb8] sm:$0xff]  ;;  %v1373_v19 = vsub.f32 %v4282_v44, %v1372_v6  ;;  %v4430_v12 = vsub.f32 %v4289_v55, %v1295_v39 }
  0xd8   :  { %3444 = vmatpush3.bf16.msra.mxu1 %v4072_v50  ;;  %3350 = vmatprep.subr.bf16.mxu0 %v3791_v18  ;;  %v1351_v50 = vand.u32 4294901760, %v4237_v24  ;;  %v1298_v3 = vand.u32 4294901760, %v4294_v49 }
  0xd9   :  { %3446 = vmatprep.subr.bf16.mxu1 %v3793_v21 }
  0xda   :  { %2906 = vmatmul.mubr.msk.f32.vlgmr.msra.gmra.mrb[0].mxu0 %vm55_vm0, %v4088_v30  ;;  %v1352_v46 = vsub.f32 %v4237_v24, %v1351_v50 }
  0xdb   :  { %3020 = vmatmul.mubr.msk.f32.vlgmr.msra.gmra.mrb[0].mxu1 %vm55_vm0, %v4086_v29  ;;  %3352 = vmatpush3.bf16.msra.mxu0 %v3791_v18  ;;  %v2559_v18 = vld [vmem:[%s4625_s2 + $0xc0] sm:$0xff] }
  0xdc   :  { %2924 = vmatprep.mubr.msk.f32.mxu0 %vm55_vm0, %v4076_v9  ;;  %3448 = vmatpush3.bf16.msra.mxu1 %v3793_v21  ;;  %v2545_v21 = vld [vmem:[%s4625_s2 + $0x90] sm:$0xff]  ;;  %v1884_v2 = vand.u32 4294901760, %v2559_v18  ;;  %v1292_v9 = vand.u32 4294901760, %v4267_v13  ;;  %v1353_v62 = vand.u32 4294901760, %v1352_v46 }
  0xdd   :  { %3038 = vmatprep.mubr.msk.f32.mxu1 %vm55_vm0, %v4074_v8  ;;  %3354 = vmatprep.subr.bf16.mxu0 %v3829_v32  ;;  %v1283_v20 = vand.u32 4294901760, %v2545_v21  ;;  %v1289_v8 = vand.u32 4294901760, %v4262_v51 }
  0xde   :  { %3450 = vmatprep.subr.bf16.mxu1 %v3831_v33  ;;  %v4299_v5 = vsub.f32 %v2559_v18, %v1884_v2  ;;  %v4313_v0 = vpack.c.bf16 %v1887_v7, %v1884_v2  ;;  %v4635_v2 = vand.u32 4294901760, %v4350_v11 }
  0xdf   :  { %3356 = vmatpush3.bf16.msra.mxu0 %v3829_v32  ;;  %v1890_v32 = vand.u32 4294901760, %v4248_v40  ;;  %v4324_v10 = vpack.c.bf16 %v1286_v47, %v1283_v20  ;;  %v4338_v28 = vpack.c.bf16 %v1292_v9, %v1289_v8  ;;  %v4348_v4 = vsub.f32 %v2545_v21, %v1283_v20 }
  0xe0   :  { %3452 = vmatpush3.bf16.msra.mxu1 %v3831_v33  ;;  %3358 = vmatprep.subr.bf16.mxu0 %v3864_v42  ;;  %v1893_v33 = vand.u32 4294901760, %v4256_v36  ;;  %v1979_v52 = vand.u32 4294901760, %v4299_v5  ;;  %v1987_v21 = vsub.f32 %v4304_v26, %v1986_v48  ;;  %v4394_v7 = vsub.f32 %v4262_v51, %v1289_v8 }
  0xe1   :  { %3454 = vmatprep.subr.bf16.mxu1 %v3875_v45  ;;  %v4381_v34 = vsub.f32 %v4248_v40, %v1890_v32  ;;  %v1381_v47 = vand.u32 4294901760, %v1380_v1  ;;  %v4410_v51 = vsub.f32 %v4280_v43, %v1899_v38 }
  0xe2   :  { %v4336_v27 = vpack.c.bf16 %v1893_v33, %v1890_v32  ;;  %v1980_v18 = vsub.f32 %v4299_v5, %v1979_v52  ;;  %v4384_v53 = vsub.f32 %v4256_v36, %v1893_v33  ;;  %v1374_v36 = vand.u32 4294901760, %v1373_v19 }
  0xe3   :  { %3360 = vmatpush3.bf16.msra.mxu0 %v3864_v42  ;;  %v4320_v42 = vld [vmem:[%s4625_s2 + $0xf0] sm:$0xff]  ;;  %v4407_v32 = vsub.f32 %v4275_v17, %v1896_v35  ;;  %v1988_v8 = vand.u32 4294901760, %v1987_v21  ;;  %v4631_v46 = vand.u32 4294901760, %v4381_v34  ;;  %v1394_v17 = vsub.f32 %v4350_v11, %v4635_v2 }
  0xe4   :  { %3456 = vmatpush3.bf16.msra.mxu1 %v3875_v45  ;;  %3362 = vmatprep.subr.bf16.mxu0 %v3916_v61  ;;  %v4329_v45 = vld [vmem:[%s4625_s2 + $0xf8] sm:$0xff]  ;;  %v1902_v59 = vand.u32 4294901760, %v4320_v42  ;;  %v1981_v33 = vand.u32 4294901760, %v1980_v18  ;;  %v4630_v31 = vand.u32 4294901760, %v4384_v53  ;;  %v4627_v43 = vand.u32 4294901760, %v4394_v7  ;;  %s3742_s2 = smov 8  }
  0xe5   :  { %3458 = vmatprep.subr.bf16.mxu1 %v3927_v63  ;;  %v1905_v14 = vand.u32 4294901760, %v4329_v45  ;;  %v4435_v19 = vsub.f32 %v4294_v49, %v1298_v3 }
  0xe6   :  { %v4441_v1 = vsub.f32 %v4320_v42, %v1902_v59  ;;  %v3573_v55 = vpack.c.bf16 %v1988_v8, %v1981_v33  ;;  %v2001_v49 = vsub.f32 %v4384_v53, %v4630_v31 }
  0xe7   :  { %3364 = vmatpush3.bf16.msra.mxu0 %v3916_v61  ;;  %v4360_v61 = vpack.c.bf16 %v1298_v3, %v1295_v39  ;;  %v4400_v40 = vpack.c.bf16 %v1905_v14, %v1902_v59  ;;  %v4444_v18 = vsub.f32 %v4329_v45, %v1905_v14  ;;  %v1994_v39 = vsub.f32 %v4381_v34, %v4631_v46 }
  0xe8   :  { %3460 = vmatpush3.bf16.msra.mxu1 %v3927_v63  ;;  %3462 = vmatprep.subr.bf16.mxu0 %v4307_v60  ;;  %v1274_v63 = vsel %vm55_vm0, %v4114_v37, 0  ;;  %v1395_v59 = vand.u32 4294901760, %v1394_v17  ;;  %v1401_v45 = vsub.f32 %v4394_v7, %v4627_v43 }
  0xe9   :  { %3558 = vmatprep.subr.bf16.mxu1 %v4313_v0  ;;  %v4396_v20 = vsub.f32 %v1274_v63, %v1274_v63  ;;  %v4633_v63 = vand.u32 4294901760, %v4407_v32  ;;  %v2028_v17 = vand.u32 4294901760, %v4444_v18  ;;  %v1995_v43 = vand.u32 4294901760, %v1994_v39 }
  0xea   :  { %2925 = vmatmul.mubr.msk.f32.vlgmr.msra.gmra.mrb[0].mxu0 %vm55_vm0, %v4088_v30  ;;  %v1386_v30 = vand.u32 4294901760, %v4348_v4  ;;  %v1402_v46 = vand.u32 4294901760, %v1401_v45 }
  0xeb   :  { %3039 = vmatmul.mubr.msk.f32.vlgmr.msra.gmra.mrb[0].mxu1 %vm55_vm0, %v4086_v29  ;;  %3464 = vmatpush3.bf16.msra.mxu0 %v4307_v60  ;;  %v4403_v29 = vsub.f32 %v4267_v13, %v1292_v9  ;;  %v4629_v13 = vand.u32 4294901760, %v4389_v41  ;;  %v4632_v35 = vand.u32 4294901760, %v4396_v20  ;;  %v2008_v33 = vsub.f32 %v4407_v32, %v4633_v63 }
  0xec   :  { %3560 = vmatpush3.bf16.msra.mxu1 %v4313_v0  ;;  %3466 = vmatprep.subr.bf16.mxu0 %v4324_v10  ;;  %v1387_v9 = vsub.f32 %v4348_v4, %v1386_v30 }
  0xed   :  { %3562 = vmatprep.subr.bf16.mxu1 %v4336_v27  ;;  %3057 = vmatprep.mubr.f32.mxu0 %v1353_v62  ;;  %v4628_v38 = vand.u32 4294901760, %v4403_v29  ;;  %v4634_v62 = vand.u32 4294901760, %v4410_v51  ;;  %v1969_v3 = vsub.f32 %v4389_v41, %v4629_v13  ;;  %v1362_v14 = vsub.f32 %v4396_v20, %v4632_v35 }
  0xee   :  { %3171 = vmatprep.mubr.f32.mxu1 %v1960_v23  ;;  %v3477_v23 = vpack.c.bf16 %v1381_v47, %v1374_v36  ;;  %v1388_v42 = vand.u32 4294901760, %v1387_v9  ;;  %v1414_v36 = vand.u32 4294901760, %v4430_v12  ;;  %v1421_v47 = vand.u32 4294901760, %v4435_v19 }
  0xef   :  { %3468 = vmatpush3.bf16.msra.mxu0 %v4324_v10  ;;  %v1408_v21 = vsub.f32 %v4403_v29, %v4628_v38  ;;  %v2015_v8 = vsub.f32 %v4410_v51, %v4634_v62  ;;  %v4636_v9 = vand.u32 4294901760, %v4441_v1  ;;  %v2002_v38 = vand.u32 4294901760, %v2001_v49 }
  0xf0   :  { %3564 = vmatpush3.bf16.msra.mxu1 %v4336_v27  ;;  %3470 = vmatprep.subr.bf16.mxu0 %v4338_v28  ;;  %v1970_v13 = vand.u32 4294901760, %v1969_v3  ;;  %v3481_v31 = vpack.c.bf16 %v1395_v59, %v1388_v42  ;;  %v1363_v35 = vand.u32 4294901760, %v1362_v14  ;;  %v1415_v62 = vsub.f32 %v4430_v12, %v1414_v36 }
  0xf1   :  { %3566 = vmatprep.subr.bf16.mxu1 %v4345_v54  ;;  %v1409_v63 = vand.u32 4294901760, %v1408_v21  ;;  %v1422_v2 = vsub.f32 %v4435_v19, %v1421_v47  ;;  %v2009_v39 = vand.u32 4294901760, %v2008_v33  ;;  %v2016_v49 = vand.u32 4294901760, %v2015_v8 }
  0xf2   :  { %v2022_v3 = vsub.f32 %v4441_v1, %v4636_v9  ;;  %v2029_v42 = vsub.f32 %v4444_v18, %v2028_v17  ;;  %v3577_v59 = vpack.c.bf16 %v2002_v38, %v1995_v43  ;;  %v1416_v14 = vand.u32 4294901760, %v1415_v62 }
  0xf3   :  { %3472 = vmatpush3.bf16.msra.mxu0 %v4338_v28  ;;  %v3485_v45 = vpack.c.bf16 %v1409_v63, %v1402_v46  ;;  %v1423_v21 = vand.u32 4294901760, %v1422_v2  ;;  %v3581_v33 = vpack.c.bf16 %v2016_v49, %v2009_v39  ;;  %v3493_v2 = vpack.c.bf16 %v4297_v58, %v4282_v44 }
  0xf4   :  { %3568 = vmatpush3.bf16.msra.mxu1 %v4345_v54  ;;  %3474 = vmatprep.subr.bf16.mxu0 %v4360_v61  ;;  %v2023_v8 = vand.u32 4294901760, %v2022_v3  ;;  %v2030_v9 = vand.u32 4294901760, %v2029_v42  ;;  %v3589_v46 = vpack.c.bf16 %v4304_v26, %v4299_v5  ;;  %v3501_v38 = vpack.c.bf16 %v4403_v29, %v4394_v7 }
  0xf5   :  { %3570 = vmatprep.subr.bf16.mxu1 %v4400_v40  ;;  %v3597_v63 = vpack.c.bf16 %v4410_v51, %v4407_v32  ;;  %v3505_v62 = vpack.c.bf16 %v4435_v19, %v4430_v12  ;;  %v4637_v44 = vand.u32 4294901760, %v4350_v11  ;;  %v4638_v58 = vand.u32 4294901760, %v4396_v20 }
  0xf6   :  { %v3585_v43 = vpack.c.bf16 %v2030_v9, %v2023_v8  ;;  %v4640_v5 = vand.u32 4294901760, %v4384_v53 }
  0xf7   :  { %3476 = vmatpush3.bf16.msra.mxu0 %v4360_v61 }
  0xf8   :  { %3572 = vmatpush3.bf16.msra.mxu1 %v4400_v40  ;;  %3478 = vmatprep.subr.bf16.mxu0 %v3477_v23 }
  0xf9   :  { %3574 = vmatprep.subr.bf16.mxu1 %v3573_v55 }
  0xfa   :  { %3058 = vmatmul.mubr.f32.vlgmr.msra.gmra.mrb[2].mxu0 %v1363_v35  ;;  %v3593_v35 = vpack.c.bf16 %v4384_v53, %v4381_v34  ;;  %v3537_v53 = vpack.c.bf16 %v1421_v47, %v1414_v36 }
  0xfb   :  { %3172 = vmatmul.mubr.f32.vlgmr.msra.gmra.mrb[2].mxu1 %v1970_v13  ;;  %3480 = vmatpush3.bf16.msra.mxu0 %v3477_v23  ;;  %v3489_v13 = vpack.c.bf16 %v1423_v21, %v1416_v14  ;;  %v3601_v23 = vpack.c.bf16 %v4444_v18, %v4441_v1 }
  0xfc   :  { %3076 = vmatprep.mubr.msk.f32.mxu0 %vm55_vm0, %v4116_v57  ;;  %3576 = vmatpush3.bf16.msra.mxu1 %v3573_v55 }
  0xfd   :  { %3190 = vmatprep.mubr.msk.f32.mxu1 %vm55_vm0, %v4118_v15  ;;  %3482 = vmatprep.subr.bf16.mxu0 %v3481_v31 }
  0xfe   :  { %3578 = vmatprep.subr.bf16.mxu1 %v3577_v59 }
  0xff   :  { %3484 = vmatpush3.bf16.msra.mxu0 %v3481_v31  ;;  %v3497_v31 = vpack.c.bf16 %v4350_v11, %v4348_v4  ;;  %v4644_v4 = vand.u32 4294901760, %v4407_v32  ;;  %v4645_v11 = vand.u32 4294901760, %v4410_v51 }
 0x100   :  { %3580 = vmatpush3.bf16.msra.mxu1 %v3577_v59  ;;  %3486 = vmatprep.subr.bf16.mxu0 %v3485_v45 }
 0x101   :  { %3582 = vmatprep.subr.bf16.mxu1 %v3581_v33 }
 0x103   :  { %3488 = vmatpush3.bf16.msra.mxu0 %v3485_v45 }
 0x104   :  { %3584 = vmatpush3.bf16.msra.mxu1 %v3581_v33  ;;  %3490 = vmatprep.subr.bf16.mxu0 %v3489_v13 }
 0x105   :  { %3586 = vmatprep.subr.bf16.mxu1 %v3585_v43 }
 0x107   :  { %3492 = vmatpush3.bf16.msra.mxu0 %v3489_v13 }
 0x108   :  { %3588 = vmatpush3.bf16.msra.mxu1 %v3585_v43  ;;  %3494 = vmatprep.subr.bf16.mxu0 %v3493_v2 }
 0x109   :  { %3590 = vmatprep.subr.bf16.mxu1 %v3589_v46 }
 0x10a   :  { %3077 = vmatmul.mubr.msk.f32.vlgmr.msra.gmra.mrb[2].mxu0 %vm55_vm0, %v4114_v37 }
 0x10b   :  { %3191 = vmatmul.mubr.msk.f32.vlgmr.msra.gmra.mrb[2].mxu1 %vm55_vm0, %v4120_v16  ;;  %3496 = vmatpush3.bf16.msra.mxu0 %v3493_v2 }
 0x10c   :  { %3095 = vmatprep.mubr.f32.mxu0 %v4237_v24  ;;  %3592 = vmatpush3.bf16.msra.mxu1 %v3589_v46  ;;  %v3525_v24 = vpack.c.bf16 %v1379_v22, %v1372_v6  ;;  %v4641_v6 = vand.u32 4294901760, %v4389_v41  ;;  %v4642_v22 = vand.u32 4294901760, %v4394_v7 }
 0x10d   :  { %3209 = vmatprep.mubr.f32.mxu1 %v4251_v56  ;;  %3498 = vmatprep.subr.bf16.mxu0 %v3497_v31  ;;  %v3621_v56 = vpack.c.bf16 %v1986_v48, %v1979_v52  ;;  %v4643_v52 = vand.u32 4294901760, %v4403_v29 }
 0x10e   :  { %3594 = vmatprep.subr.bf16.mxu1 %v3593_v35 }
 0x10f   :  { %3500 = vmatpush3.bf16.msra.mxu0 %v3497_v31  ;;  %v3533_v48 = vpack.c.bf16 %v4643_v52, %v4642_v22 }
 0x110   :  { %3596 = vmatpush3.bf16.msra.mxu1 %v3593_v35  ;;  %3502 = vmatprep.subr.bf16.mxu0 %v3501_v38 }
 0x111   :  { %3598 = vmatprep.subr.bf16.mxu1 %v3597_v63 }
 0x113   :  { %3504 = vmatpush3.bf16.msra.mxu0 %v3501_v38 }
 0x114   :  { %3600 = vmatpush3.bf16.msra.mxu1 %v3597_v63  ;;  %3506 = vmatprep.subr.bf16.mxu0 %v3505_v62 }
 0x115   :  { %3602 = vmatprep.subr.bf16.mxu1 %v3601_v23 }
 0x117   :  { %3508 = vmatpush3.bf16.msra.mxu0 %v3505_v62 }
 0x118   :  { %3604 = vmatpush3.bf16.msra.mxu1 %v3601_v23  ;;  %3510 = vmatprep.subr.bf16.mxu0 %v4307_v60 }
 0x119   :  { %3606 = vmatprep.subr.bf16.mxu1 %v4313_v0 }
 0x11a   :  { %3096 = vmatmul.mubr.f32.vlgmr.msra.gmra.mrb[2].mxu0 %v4396_v20 }
 0x11b   :  { %3210 = vmatmul.mubr.f32.vlgmr.msra.gmra.mrb[2].mxu1 %v4389_v41  ;;  %3512 = vmatpush3.bf16.msra.mxu0 %v4307_v60  ;;  %v4646_v41 = vand.u32 4294901760, %v4441_v1 }
 0x11c   :  { %3114 = vmatprep.mubr.f32.mxu0 %v1351_v50  ;;  %3608 = vmatpush3.bf16.msra.mxu1 %v4313_v0  ;;  %v3529_v50 = vpack.c.bf16 %v4637_v44, %v1386_v30 }
 0x11d   :  { %3228 = vmatprep.mubr.f32.mxu1 %v1958_v25  ;;  %3514 = vmatprep.subr.bf16.mxu0 %v4324_v10  ;;  %v4639_v25 = vand.u32 4294901760, %v4381_v34  ;;  %v3629_v34 = vpack.c.bf16 %v4645_v11, %v4644_v4  ;;  %v3633_v30 = vpack.c.bf16 %v2028_v17, %v4646_v41 }
 0x11e   :  { %3610 = vmatprep.subr.bf16.mxu1 %v4336_v27 }
 0x11f   :  { %3516 = vmatpush3.bf16.msra.mxu0 %v4324_v10  ;;  %v3625_v26 = vpack.c.bf16 %v4640_v5, %v4639_v25 }
 0x120   :  { %3612 = vmatpush3.bf16.msra.mxu1 %v4336_v27  ;;  %3518 = vmatprep.subr.bf16.mxu0 %v4338_v28 }
 0x121   :  { %3614 = vmatprep.subr.bf16.mxu1 %v4345_v54 }
 0x123   :  { %3520 = vmatpush3.bf16.msra.mxu0 %v4338_v28 }
 0x124   :  { %3616 = vmatpush3.bf16.msra.mxu1 %v4345_v54  ;;  %3522 = vmatprep.subr.bf16.mxu0 %v4360_v61 }
 0x125   :  { %3618 = vmatprep.subr.bf16.mxu1 %v4400_v40 }
 0x127   :  { %3524 = vmatpush3.bf16.msra.mxu0 %v4360_v61 }
 0x128   :  { %3620 = vmatpush3.bf16.msra.mxu1 %v4400_v40  ;;  %3526 = vmatprep.subr.bf16.mxu0 %v3525_v24 }
 0x129   :  { %3622 = vmatprep.subr.bf16.mxu1 %v3621_v56 }
 0x12a   :  { %3115 = vmatmul.mubr.f32.vlgmr.msra.gmra.mrb[2].mxu0 %v4638_v58 }
 0x12b   :  { %3229 = vmatmul.mubr.f32.vlgmr.msra.gmra.mrb[2].mxu1 %v4641_v6  ;;  %3528 = vmatpush3.bf16.msra.mxu0 %v3525_v24 }
 0x12c   :  { %3133 = vmatprep.mubr.msk.f32.mxu0 %vm55_vm0, %v4116_v57  ;;  %3624 = vmatpush3.bf16.msra.mxu1 %v3621_v56 }
 0x12d   :  { %3247 = vmatprep.mubr.msk.f32.mxu1 %vm55_vm0, %v4118_v15  ;;  %3530 = vmatprep.subr.bf16.mxu0 %v3529_v50 }
 0x12e   :  { %3626 = vmatprep.subr.bf16.mxu1 %v3625_v26 }
 0x12f   :  { %3532 = vmatpush3.bf16.msra.mxu0 %v3529_v50 }
 0x130   :  { %3628 = vmatpush3.bf16.msra.mxu1 %v3625_v26  ;;  %3534 = vmatprep.subr.bf16.mxu0 %v3533_v48 }
 0x131   :  { %3630 = vmatprep.subr.bf16.mxu1 %v3629_v34 }
 0x133   :  { %3536 = vmatpush3.bf16.msra.mxu0 %v3533_v48 }
 0x134   :  { %3632 = vmatpush3.bf16.msra.mxu1 %v3629_v34  ;;  %3538 = vmatprep.subr.bf16.mxu0 %v3537_v53 }
 0x135   :  { %3634 = vmatprep.subr.bf16.mxu1 %v3633_v30 }
 0x137   :  { %3540 = vmatpush3.bf16.msra.mxu0 %v3537_v53 }
 0x138   :  { %3636 = vmatpush3.bf16.msra.mxu1 %v3633_v30  ;;  %3542 = vmatprep.subr.bf16.mxu0 %v4307_v60 }
 0x139   :  { %3638 = vmatprep.subr.bf16.mxu1 %v4313_v0 }
 0x13a   :  { %3134 = vmatmul.mubr.msk.f32.vlgmr.msra.gmra.mrb[2].mxu0 %vm55_vm0, %v4114_v37 }
 0x13b   :  { %3248 = vmatmul.mubr.msk.f32.vlgmr.msra.gmra.mrb[2].mxu1 %vm55_vm0, %v4120_v16  ;;  %3544 = vmatpush3.bf16.msra.mxu0 %v4307_v60 }
 0x13c   :  { %3152 = vmatprep.mubr.msk.f32.mxu0 %vm55_vm0, %v4116_v57  ;;  %3640 = vmatpush3.bf16.msra.mxu1 %v4313_v0 }
 0x13d   :  { %3266 = vmatprep.mubr.msk.f32.mxu1 %vm55_vm0, %v4118_v15  ;;  %3546 = vmatprep.subr.bf16.mxu0 %v4324_v10 }
 0x13e   :  { %3642 = vmatprep.subr.bf16.mxu1 %v4336_v27 }
 0x13f   :  { %3548 = vmatpush3.bf16.msra.mxu0 %v4324_v10 }
 0x140   :  { %3644 = vmatpush3.bf16.msra.mxu1 %v4336_v27  ;;  %3550 = vmatprep.subr.bf16.mxu0 %v4338_v28 }
 0x141   :  { %3646 = vmatprep.subr.bf16.mxu1 %v4345_v54 }
 0x143   :  { %3552 = vmatpush3.bf16.msra.mxu0 %v4338_v28 }
 0x144   :  { %3648 = vmatpush3.bf16.msra.mxu1 %v4345_v54  ;;  %3554 = vmatprep.subr.bf16.mxu0 %v4360_v61 }
 0x145   :  { %3650 = vmatprep.subr.bf16.mxu1 %v4400_v40 }
 0x147   :  { %3556 = vmatpush3.bf16.msra.mxu0 %v4360_v61 }
 0x148   :  { %3652 = vmatpush3.bf16.msra.mxu1 %v4400_v40 }
 0x14a   :  { %3153 = vmatmul.mubr.msk.f32.vlgmr.msra.gmra.mrb[2].mxu0 %vm55_vm0, %v4114_v37 }
 0x14b   :  { %3267 = vmatmul.mubr.msk.f32.vlgmr.msra.gmra.mrb[2].mxu1 %vm55_vm0, %v4120_v16 }
 0x1bd   :  { %v2926_v57 = vpop.f32.mrb[0].mxu0 }
 0x1be   :  { %v3040_v15 = vpop.f32.mrb[0].mxu1  ;;  %v632_v60 = vpop.f32.mrb[1].mxu0 }
 0x1bf   :  { %2467 = vrot.lane.b32.xlu1 %v3040_v15, %s3742_s2  ;;  %v1239_v0 = vpop.f32.mrb[1].mxu1 }
 0x1c3   :  { %2465 = vrot.lane.b32.xlu1 %v1239_v0, %s3742_s2 }
 0x21d   :  { %v3154_v10 = vpop.f32.mrb[2].mxu0 }
 0x21e   :  { %v3268_v27 = vpop.f32.mrb[2].mxu1  ;;  %2475 = vrot.lane.b32.xlu1 %v3154_v10, %s3743_s25  ;;  %v1846_v28 = vpop.f32.mrb[3].mxu0 }
 0x21f   :  { %v2453_v54 = vpop.f32.mrb[3].mxu1  ;;  %2473 = vrot.lane.b32.xlu0 %v1846_v28, %s3743_s25 }
 0x222   :  { %2483 = vrot.lane.b32.xlu1 %v3268_v27, %s3744_s26 }
 0x223   :  { %2481 = vrot.lane.b32.xlu0 %v2453_v54, %s3744_s26 }
 0x231   :  { %v2468_v37 = vpop.permute.xlu1 %2467 }
 0x232   :  { %v2489_v20 = vsel %vm2487_vm9, %v2926_v57, %v2468_v37 }
 0x235   :  { %v2466_v16 = vpop.permute.xlu1 %2465 }
 0x236   :  { %v2488_v40 = vsel %vm2487_vm9, %v632_v60, %v2466_v16 }
 0x290   :  { %v2476_v61 = vpop.permute.xlu1 %2475 }
 0x291   :  { %v2474_v7 = vpop.permute.xlu0 %2473  ;;  %v2492_v29 = vsel %vm2490_vm10, %v2489_v20, %v2476_v61 }
 0x292   :  { %v2491_v51 = vsel %vm2490_vm10, %v2488_v40, %v2474_v7 }
 0x294   :  { %v2484_v32 = vpop.permute.xlu1 %2483 }
 0x295   :  { %v2495_v12 = vsel %vm2493_vm11, %v2492_v29, %v2484_v32  ;;  %v2482_v19 = vpop.permute.xlu0 %2481 }
 0x296   :  { %2498 = vst.msk [vmem:[#allocation2 + $0x8] sm:$0xff] %vm2496_vm12, %v2495_v12  ;;  %v2494_v1 = vsel %vm2493_vm11, %v2491_v51, %v2482_v19 }
 0x297   :  { %2497 = vst.msk [vmem:[#allocation2] sm:$0xff] %vm2496_vm12, %v2494_v1 }
 0x298   :  { %3724 = shalt.err (!%p3721_p4)
}
 0x299   :  { %s3725_s4 = scalar_lea.hbm %s4626_s3, 256 }
 0x29a   :  { %p3726_p5 = scmp.ne.s32.totalorder %s4626_s3, %s3725_s4  ;;  %p3729_p6 = scmp.lt.u32.totalorder %s3725_s4, %s4626_s3 }
 0x29c   :  { %p3731_p7 = pnand %p3729_p6, %p3726_p5 }
 0x29e   :  { %3734 = shalt.err (!%p3731_p7)
}
 0x29f   :  { %s3746_s9 = smov 128  }
 0x2a0   :  { %2510 = dma.vmem_to_hbm [thread:$0]  %s2505_s27, 256, %s4626_s3, [#allocation3], %s3746_s9, %s3746_s9, %s3742_s2  }
 0x2a1   :  { %3735 = dma.done.wait [#allocation3], 256  }
 0x2a2   :  { %3736 = vsyncadd [#allocation3], 4294967040 }
 0x2a3   :  { %2514 = vsyncpa [#allocation3], 1 }

</bundles_post_ra>
